<compile_context>
chip_gen: v7x
topology: tpu7x:2x2x1
jax: 0.10.0
libtpu: 0.0.40
codegen_flags: <defaults>
</compile_context>

<pallas_src>
import jax
import jax.numpy as jnp
from jax import lax
from jax.experimental import pallas as pl
from jax.experimental.pallas import tpu as pltpu


def _round_up(x, m):
    return (x + m - 1) // m * m


# ----------------------------------------------------------------------------
# Kernel 1: fused input projection for one layer (both directions, all gates).
#   gates = x @ W_ih_fused + (b_ih + b_hh)   -> [M, 8H] f32
# ----------------------------------------------------------------------------
def _proj_kernel(x_ref, w_ref, b_ref, o_ref):
    o_ref[...] = (
        jnp.dot(x_ref[...], w_ref[...], preferred_element_type=jnp.float32)
        + b_ref[...]
    )


def _input_projection(x_tm, wih, bias):
    """x_tm: [Tp, Bp, Din] f32 -> gate pre-activations [Tp, Bp, 8H] f32."""
    Tp, Bp, Din = x_tm.shape
    N = wih.shape[1]                              # 8 * H
    M = Tp * Bp                                   # multiple of 8 (Bp % 8 == 0)
    x2 = x_tm.reshape(M, Din).astype(jnp.bfloat16)

    tm = 256 if M > 256 else M
    Mp = _round_up(M, tm)
    if Mp != M:
        x2 = jnp.pad(x2, ((0, Mp - M), (0, 0)))

    out = pl.pallas_call(
        _proj_kernel,
        out_shape=jax.ShapeDtypeStruct((Mp, N), jnp.float32),
        grid_spec=pltpu.PrefetchScalarGridSpec(
            num_scalar_prefetch=0,
            grid=(Mp // tm,),
            in_specs=[
                pl.BlockSpec((tm, Din), lambda i: (i, 0)),
                pl.BlockSpec((Din, N), lambda i: (0, 0)),
                pl.BlockSpec((1, N), lambda i: (0, 0)),
            ],
            out_specs=pl.BlockSpec((tm, N), lambda i: (i, 0)),
        ),
        compiler_params=pltpu.CompilerParams(
            dimension_semantics=("parallel",)),
    )(x2, wih, bias)
    return out[:M].reshape(Tp, Bp, N)


# ----------------------------------------------------------------------------
# Kernel 2: bidirectional LSTM recurrence over precomputed gate pre-activations.
# grid = (direction, time_chunk); the direction axis is "parallel" (one TC per
# direction on v7x), the time axis is "arbitrary" and streamed, with h/c state
# carried across chunks in VMEM scratch.
# ----------------------------------------------------------------------------
def _birnn_rec_kernel(xg_ref, whh_ref, valid_ref, out_ref, h_sc, c_sc):
    """
    xg_ref   : [TC, Bp, 4H] f32  this direction's chunk of x@W_ih + b (gates i,f,g,o)
    whh_ref  : [H, 4H]      bf16 this direction's recurrent weights
    valid_ref: [TC, Bp, 1]  f32  1.0 inside the valid prefix, 0.0 at padding
    out_ref  : [TC, Bp, H]  f32  hidden states (exactly 0 at padded positions)
    h_sc,c_sc: [Bp, H]      f32  state carried across time chunks
    """
    d = pl.program_id(0)                     # 0 = forward, 1 = backward
    TC, _, H = out_ref.shape

    @pl.when(pl.program_id(1) == 0)
    def _():
        h_sc[...] = jnp.zeros_like(h_sc)
        c_sc[...] = jnp.zeros_like(c_sc)

    w = whh_ref[...]                          # (H, 4H) bf16

    def step(s, carry):
        h, c = carry
        # forward walks the chunk 0..TC-1, backward walks it TC-1..0
        t = d * (TC - 1 - s) + (1 - d) * s
        g = xg_ref[t] + jnp.dot(h.astype(jnp.bfloat16), w,
                                preferred_element_type=jnp.float32)   # (Bp, 4H)
        i_g = jax.nn.sigmoid(g[:, 0 * H:1 * H])
        f_g = jax.nn.sigmoid(g[:, 1 * H:2 * H])
        g_g = jnp.tanh(g[:, 2 * H:3 * H])
        o_g = jax.nn.sigmoid(g[:, 3 * H:4 * H])
        c_new = f_g * c + i_g * g_g
        h_new = o_g * jnp.tanh(c_new)
        # Packed-sequence semantics: freeze state and emit exact zeros at
        # padded positions (m is exactly 0.0 or 1.0; elementwise math in f32).
        m = valid_ref[t]                      # (Bp, 1)
        c_keep = m * c_new + (1.0 - m) * c
        h_keep = m * h_new + (1.0 - m) * h
        out_ref[t] = m * h_new
        return (h_keep, c_keep)

    h_f, c_f = lax.fori_loop(0, TC, step, (h_sc[...], c_sc[...]), unroll=True)
    h_sc[...] = h_f
    c_sc[...] = c_f


def _birnn_recurrence(xg, whh, valid, *, hidden_size, time_chunk):
    """xg: [Tp, Bp, 8H] f32, whh: [2, H, 4H] bf16, valid: [Tp, Bp, 1] f32
       -> [2, Tp, Bp, H] f32 (fwd, bwd hidden states)."""
    Tp, Bp, N8 = xg.shape
    H = hidden_size
    assert N8 == 8 * H
    # Last-dim gate block must be lane-aligned: 4H % 128 == 0  (H multiple of 32).
    assert (4 * H) % 128 == 0, "hidden_size must be a multiple of 32"
    assert Tp % time_chunk == 0
    TC = time_chunk
    nT = Tp // TC

    def tmap(d, t):   # chunk order: forward 0..nT-1, backward reversed
        return d * (nT - 1 - t) + (1 - d) * t

    return pl.pallas_call(
        _birnn_rec_kernel,
        out_shape=jax.ShapeDtypeStruct((2, Tp, Bp, H), jnp.float32),
        grid_spec=pltpu.PrefetchScalarGridSpec(
            num_scalar_prefetch=0,
            grid=(2, nT),
            in_specs=[
                pl.BlockSpec((TC, Bp, 4 * H), lambda d, t: (tmap(d, t), 0, d)),
                pl.BlockSpec((None, H, 4 * H), lambda d, t: (d, 0, 0)),
                pl.BlockSpec((TC, Bp, 1), lambda d, t: (tmap(d, t), 0, 0)),
            ],
            out_specs=pl.BlockSpec((None, TC, Bp, H),
                                   lambda d, t: (d, tmap(d, t), 0, 0)),
            scratch_shapes=[pltpu.VMEM((Bp, H), jnp.float32),
                            pltpu.VMEM((Bp, H), jnp.float32)],
        ),
        compiler_params=pltpu.CompilerParams(
            dimension_semantics=("parallel", "arbitrary")),
    )(xg, whh, valid)


# ----------------------------------------------------------------------------
# Module wrapper: stacking, bidirectionality, concat_layers.
# ----------------------------------------------------------------------------
def stacked_birnn_forward(x, x_mask, params, *, concat_layers=False, time_chunk=8):
    """x: [B, T, Din] float, x_mask: [B, T] (1 = pad, 0 = valid).

    Returns [B, T, 2H] or [B, T, 2H * num_layers] if concat_layers.
    """
    B, T, _ = x.shape
    H = params[0]["whh"].shape[1]

    Bp = _round_up(B, 8)                     # sublane fill for the per-step dot
    Tp = _round_up(T, time_chunk)

    lengths = (x_mask == 0).astype(jnp.int32).sum(axis=1)            # [B]
    len_p = jnp.zeros((Bp,), jnp.int32).at[:B].set(lengths)
    valid = (jnp.arange(Tp)[:, None] < len_p[None, :]).astype(jnp.float32)
    valid = valid[:, :, None]                                        # [Tp, Bp, 1]

    x_tm = jnp.transpose(x.astype(jnp.float32), (1, 0, 2))           # [T, B, Din]
    x_tm = jnp.pad(x_tm, ((0, Tp - T), (0, Bp - B), (0, 0)))         # [Tp, Bp, Din]

    layer_in = x_tm
    outputs = []
    for lp in params:
        xg = _input_projection(layer_in, lp["wih"], lp["b"])         # [Tp, Bp, 8H]
        rec = _birnn_recurrence(xg, lp["whh"], valid,
                                hidden_size=H, time_chunk=time_chunk)
        layer_out = jnp.concatenate([rec[0], rec[1]], axis=-1)       # [Tp, Bp, 2H]
        outputs.append(layer_out)
        layer_in = layer_out

    out_tm = jnp.concatenate(outputs, axis=-1) if concat_layers else outputs[-1]
    return jnp.transpose(out_tm[:T, :B], (1, 0, 2))                  # [B, T, feat]


def init_params(key, input_size, hidden_size, num_layers):
    """PyTorch-style LSTM init (uniform +-1/sqrt(H)) in the fused kernel layout:
       wih : [Din, 8H] bf16   columns = [fwd(i,f,g,o) | bwd(i,f,g,o)]
       whh : [2, H, 4H] bf16  [fwd, bwd], gate order (i,f,g,o)
       b   : [1, 8H]   f32    b_ih + b_hh, same column layout as wih
    """
    H = hidden_size
    bound = 1.0 / float(H) ** 0.5
    params = []
    for i in range(num_layers):
        d_in = input_size if i == 0 else 2 * H
        key, *ks = jax.random.split(key, 9)
        u = lambda k, shape: jax.random.uniform(k, shape, jnp.float32, -bound, bound)
        wih_f, wih_b = u(ks[0], (d_in, 4 * H)), u(ks[1], (d_in, 4 * H))
        whh_f, whh_b = u(ks[2], (H, 4 * H)), u(ks[3], (H, 4 * H))
        b_f = u(ks[4], (1, 4 * H)) + u(ks[5], (1, 4 * H))
        b_b = u(ks[6], (1, 4 * H)) + u(ks[7], (1, 4 * H))
        params.append({
            "wih": jnp.concatenate([wih_f, wih_b], axis=1).astype(jnp.bfloat16),
            "whh": jnp.stack([whh_f, whh_b], axis=0).astype(jnp.bfloat16),
            "b": jnp.concatenate([b_f, b_b], axis=1),
        })
    return params


if __name__ == "__main__":
    key = jax.random.PRNGKey(0)
    B, T, D, H, L = 2, 8, 32, 32, 2

    k_x, k_p = jax.random.split(key)
    x = jax.random.normal(k_x, (B, T, D), jnp.float32)

    # lengths 8 and 5 -> x_mask: 1 at padded positions, 0 at valid positions
    lengths = jnp.array([8, 5], dtype=jnp.int32)
    x_mask = (jnp.arange(T)[None, :] >= lengths[:, None]).astype(jnp.int32)

    params = init_params(k_p, D, H, L)

    out = stacked_birnn_forward(x, x_mask, params, concat_layers=True)
    out = jax.block_until_ready(out)

    assert out.shape == (B, T, 2 * H * L), out.shape
    # Packed-sequence semantics: padded time steps must be exactly zero.
    pad_vals = out[1, 5:, :]
    assert float(jnp.max(jnp.abs(pad_vals))) == 0.0

    print("KERNEL_OK")
</pallas_src>

<mosaic_0001>
module attributes {stable_mosaic.version = 11 : i64} {
  func.func @_proj_kernel(%arg0: i32, %arg1: memref<64x32xbf16, #tpu.memory_space<vmem>>, %arg2: memref<32x256xbf16, #tpu.memory_space<vmem>>, %arg3: memref<1x256xf32, #tpu.memory_space<vmem>>, %arg4: memref<64x256xf32, #tpu.memory_space<vmem>>) attributes {dimension_semantics = [#tpu.dimension_semantics<parallel>], iteration_bounds = array<i64: 1>, scalar_prefetch = 0 : i64, scratch_operands = 0 : i64, tpu.core_type = #tpu.core_type<tc>, window_params = [{transform_indices = @transform_0, window_bounds = array<i64: 64, 32>}, {pipeline_mode = #tpu.pipeline_mode<synchronous>, transform_indices = @transform_1, window_bounds = array<i64: 32, 256>}, {pipeline_mode = #tpu.pipeline_mode<synchronous>, transform_indices = @transform_2, window_bounds = array<i64: 1, 256>}, {transform_indices = @transform_3, window_bounds = array<i64: 64, 256>}]} {
    %c0 = arith.constant 0 : index
    %c0_0 = arith.constant 0 : index
    %0 = vector.load %arg1[%c0, %c0_0] : memref<64x32xbf16, #tpu.memory_space<vmem>>, vector<64x32xbf16>
    %c0_1 = arith.constant 0 : index
    %c0_2 = arith.constant 0 : index
    %1 = vector.load %arg2[%c0_1, %c0_2] : memref<32x256xbf16, #tpu.memory_space<vmem>>, vector<32x256xbf16>
    %cst = arith.constant dense<0.000000e+00> : vector<64x256xf32>
    %2 = tpu.matmul %0, %1, %cst {dimension_numbers = #tpu.dot_dimension_numbers<[1], [0], [0], [1], [0, 0, 1, 1], [], []>} : vector<64x32xbf16>, vector<32x256xbf16>, vector<64x256xf32> -> vector<64x256xf32>
    %c0_3 = arith.constant 0 : index
    %c0_4 = arith.constant 0 : index
    %3 = vector.load %arg3[%c0_3, %c0_4] : memref<1x256xf32, #tpu.memory_space<vmem>>, vector<1x256xf32>
    %4 = vector.broadcast %3 : vector<1x256xf32> to vector<64x256xf32>
    %5 = arith.addf %2, %4 : vector<64x256xf32>
    %c0_5 = arith.constant 0 : index
    %c0_6 = arith.constant 0 : index
    %6 = vector.load %arg4[%c0_5, %c0_6] : memref<64x256xf32, #tpu.memory_space<vmem>>, vector<64x256xf32>
    tpu.vector_store %arg4[%c0_5, %c0_6], %5 {strides = array<i32>} : memref<64x256xf32, #tpu.memory_space<vmem>>, vector<64x256xf32>,
    return
  }
  func.func @transform_0(%arg0: i32) -> (i32, i32) {
    %c0_i32 = arith.constant 0 : i32
    %c0_i32_0 = arith.constant 0 : i32
    return %arg0, %c0_i32 : i32, i32
  }
  func.func @transform_1(%arg0: i32) -> (i32, i32) {
    %c0_i32 = arith.constant 0 : i32
    %c0_i32_0 = arith.constant 0 : i32
    %c0_i32_1 = arith.constant 0 : i32
    return %c0_i32, %c0_i32_0 : i32, i32
  }
  func.func @transform_2(%arg0: i32) -> (i32, i32) {
    %c0_i32 = arith.constant 0 : i32
    %c0_i32_0 = arith.constant 0 : i32
    %c0_i32_1 = arith.constant 0 : i32
    return %c0_i32, %c0_i32_0 : i32, i32
  }
  func.func @transform_3(%arg0: i32) -> (i32, i32) {
    %c0_i32 = arith.constant 0 : i32
    %c0_i32_0 = arith.constant 0 : i32
    return %arg0, %c0_i32 : i32, i32
  }
}

</mosaic_0001>

<bundles_post_ra>
// kernel: tpu_custom_call.1
= control target key start
LH: loop header
LB: loop body
LE: loop exit
PB: predicated region body
PF: predicated region fallthrough
CT: control target
= control target key end

     0   :  { %v252_v2 = vmov 0   ;;  %vm80_vm0 = vcmask 261120   ;;  %s315_s0 = inlined_call_operand.vmem [shape: bf16[64,32], index: 0, kind: input, shape index: {}]   ;;  %s316_s1 = inlined_call_operand.vmem [shape: bf16[32,256], index: 1, kind: input, shape index: {}]   ;;  %s317_s2 = inlined_call_operand.vmem [shape: f32[1,256], index: 2, kind: input, shape index: {}]   ;;  %s318_s3 = inlined_call_operand.hbm [shape: f32[64,256], index: 3, kind: output, shape index: {}]  }
   0x1   :  { %v218_v0 = vld [vmem:[%s316_s1 + $0x4] ss:$8 sps:$4 sm:$0xff]   ;;  %v220_v1 = vld [vmem:[%s316_s1] ss:$8 sps:$4 sm:$0xff]   ;;  %125 = vmatprep.mubr.bf16.mxu0 %v252_v2  ;;  %145 = vmatprep.mubr.bf16.mxu1 %v252_v2  ;;  %v221_v3 = vld [vmem:[%s316_s1 + $0x14] ss:$8 sps:$4 sm:$0xff]  }
   0x2   :  { %93 = vmatprep.subr.bf16.mxu0 %v218_v0  ;;  %210 = vmatprep.subr.bf16.mxu1 %v218_v0  ;;  %v223_v4 = vld [vmem:[%s316_s1 + $0x10] ss:$8 sps:$4 sm:$0xff]   ;;  %v224_v5 = vld [vmem:[%s315_s0] sm:$0xff]  }
   0x3   :  { %94 = vmatpush1.bf16.msra.mxu0 %v220_v1  ;;  %212 = vmatpush1.bf16.msra.mxu1 %v220_v1  ;;  %v225_v6 = vld [vmem:[%s315_s0 + $0x10] sm:$0xff]  }
   0x4   :  { %95 = vmatprep.subr.bf16.mxu0 %v221_v3  ;;  %211 = vmatprep.subr.bf16.mxu1 %v221_v3 }
   0x7   :  { %96 = vmatpush1.bf16.msra.mxu0 %v223_v4  ;;  %213 = vmatpush1.bf16.msra.mxu1 %v223_v4 }
   0x8   :  { %8 = vsyncpa [#allocation3], 0  ;;  %v226_v7 = vld [vmem:[%s315_s0 + $0x8] sm:$0xff]   ;;  %v227_v8 = vld [vmem:[%s315_s0 + $0x18] sm:$0xff]   ;;  %v30_v9 = vlaneseq  ;;  %s253_s0 = smov [#allocation2]  }
   0x9   :  { %v28_v12 = vld [vmem:[%s317_s2] sm:$0x3]  ;;  %s187_s2 = sshll.u32 %s253_s0, 4  ;;  %s188_s2 = int_to_ptr.vmem [resolvable:$true] %s187_s2 }
   0xa   :  { %206 = vmatmul.mubr.msk.bf16.vlgmr.msra.gmra.mrb[0].mxu0 %vm80_vm0, %v224_v5  ;;  %208 = vmatmul.mubr.msk.bf16.vlgmr.msra.gmra.mrb[0].mxu1 %vm80_vm0, %v225_v6  ;;  %v31_v10 = vshrl.u32 %v30_v9, 7  ;;  %s228_s29 = scalar_lea.vmem %s188_s2, 2048  ;;  %p233_p1 = scmp.lt.s32.totalorder %s188_s2, %s188_s2 }
   0xb   :  { %135 = vmatprep.mubr.bf16.mxu0 %v252_v2  ;;  %155 = vmatprep.mubr.bf16.mxu1 %v252_v2  ;;  %p229_p0 = scmp.ne.s32.totalorder %s188_s2, %s228_s29  ;;  %p234_p2 = scmp.lt.s32.totalorder %s228_s29, %s228_s29 }
   0xc   :  { %v32_v11 = vsub.s32 0, %v31_v10  ;;  %v36_v13 = vsub.s32 1, %v31_v10 }
   0xd   :  { %p235_p3 = por %p234_p2, %p233_p1 }
   0xe   :  { %v33_v14 = vrot.slane %v28_v12, %v32_v11  ;;  %v37_v15 = vrot.slane %v28_v12, %v36_v13 }
   0xf   :  { %p236_p4 = pnand %p235_p3, %p229_p0 }
  0x12   :  { %207 = vmatmul.mubr.msk.bf16.gmra.mrb[4].mxu0 %vm80_vm0, %v226_v7  ;;  %209 = vmatmul.mubr.msk.bf16.gmra.mrb[4].mxu1 %vm80_vm0, %v227_v8 }
  0xdd   :  { %v127_v16 = vpop.f32.mrb[0].mxu0  ;;  %v147_v17 = vpop.f32.mrb[0].mxu1 }
  0xde   :  { %v128_v18 = vadd.f32 %v127_v16, %v33_v14  ;;  %v148_v19 = vadd.f32 %v147_v17, %v33_v14  ;;  %v129_v20 = vpop.f32.mrb[1].mxu0  ;;  %v149_v21 = vpop.f32.mrb[1].mxu1 }
  0xdf   :  { %v130_v22 = vadd.f32 %v129_v20, %v37_v15  ;;  %v150_v23 = vadd.f32 %v149_v21, %v37_v15  ;;  %v131_v24 = vpop.f32.mrb[2].mxu0  ;;  %v151_v25 = vpop.f32.mrb[2].mxu1 }
  0xe0   :  { %166 = vst [vmem:[#allocation2] sm:$0xff] %v128_v18  ;;  %174 = vst [vmem:[#allocation2 + $0x40] sm:$0xff] %v148_v19  ;;  %v132_v26 = vadd.f32 %v131_v24, %v33_v14  ;;  %v152_v27 = vadd.f32 %v151_v25, %v33_v14  ;;  %v133_v28 = vpop.f32.mrb[3].mxu0  ;;  %v153_v29 = vpop.f32.mrb[3].mxu1 }
  0xe1   :  { %167 = vst [vmem:[#allocation2 + $0x8] sm:$0xff] %v130_v22  ;;  %175 = vst [vmem:[#allocation2 + $0x48] sm:$0xff] %v150_v23  ;;  %v134_v30 = vadd.f32 %v133_v28, %v37_v15  ;;  %v154_v31 = vadd.f32 %v153_v29, %v37_v15 }
  0xe2   :  { %168 = vst [vmem:[#allocation2 + $0x10] sm:$0xff] %v132_v26  ;;  %176 = vst [vmem:[#allocation2 + $0x50] sm:$0xff] %v152_v27 }
  0xe3   :  { %169 = vst [vmem:[#allocation2 + $0x18] sm:$0xff] %v134_v30  ;;  %177 = vst [vmem:[#allocation2 + $0x58] sm:$0xff] %v154_v31 }
  0xe5   :  { %v137_v32 = vpop.f32.mrb[4].mxu0  ;;  %v157_v33 = vpop.f32.mrb[4].mxu1 }
  0xe6   :  { %v138_v34 = vadd.f32 %v137_v32, %v33_v14  ;;  %v158_v35 = vadd.f32 %v157_v33, %v33_v14  ;;  %v139_v36 = vpop.f32.mrb[5].mxu0  ;;  %v159_v37 = vpop.f32.mrb[5].mxu1 }
  0xe7   :  { %v140_v38 = vadd.f32 %v139_v36, %v37_v15  ;;  %v160_v39 = vadd.f32 %v159_v37, %v37_v15  ;;  %v141_v40 = vpop.f32.mrb[6].mxu0  ;;  %v161_v41 = vpop.f32.mrb[6].mxu1 }
  0xe8   :  { %170 = vst [vmem:[#allocation2 + $0x20] sm:$0xff] %v138_v34  ;;  %178 = vst [vmem:[#allocation2 + $0x60] sm:$0xff] %v158_v35  ;;  %v142_v42 = vadd.f32 %v141_v40, %v33_v14  ;;  %v162_v43 = vadd.f32 %v161_v41, %v33_v14  ;;  %v143_v44 = vpop.f32.mrb[7].mxu0  ;;  %v163_v45 = vpop.f32.mrb[7].mxu1 }
  0xe9   :  { %171 = vst [vmem:[#allocation2 + $0x28] sm:$0xff] %v140_v38  ;;  %179 = vst [vmem:[#allocation2 + $0x68] sm:$0xff] %v160_v39  ;;  %v144_v46 = vadd.f32 %v143_v44, %v37_v15  ;;  %v164_v47 = vadd.f32 %v163_v45, %v37_v15 }
  0xea   :  { %172 = vst [vmem:[#allocation2 + $0x30] sm:$0xff] %v142_v42  ;;  %180 = vst [vmem:[#allocation2 + $0x70] sm:$0xff] %v162_v43 }
  0xeb   :  { %173 = vst [vmem:[#allocation2 + $0x38] sm:$0xff] %v144_v46  ;;  %181 = vst [vmem:[#allocation2 + $0x78] sm:$0xff] %v164_v47 }
  0xec   :  { %239 = shalt.err (!%p236_p4)
}
  0xed   :  { %s240_s5 = scalar_lea.hbm %s318_s3, 2048 }
  0xee   :  { %p241_p5 = scmp.ne.s32.totalorder %s318_s3, %s240_s5  ;;  %p244_p6 = scmp.lt.u32.totalorder %s240_s5, %s318_s3 }
  0xf0   :  { %p246_p7 = pnand %p244_p6, %p241_p5 }
  0xf2   :  { %249 = shalt.err (!%p246_p7)
}
  0xf3   :  { %s254_s10 = smov 256   ;;  %s255_s11 = smov 16  }
  0xf4   :  { %193 = dma.vmem_to_hbm [thread:$0]  %s188_s2, 2048, %s318_s3, [#allocation3], %s254_s10, %s254_s10, %s255_s11  }
  0xf5   :  { %250 = dma.done.wait [#allocation3], 2048  }
  0xf6   :  { %251 = vsyncadd [#allocation3], 4294965248 }
  0xf7   :  { %197 = vsyncpa [#allocation3], 1 }

</bundles_post_ra>
